<compile_context>
chip_gen: v5e
topology: v5e:2x2
jax: 0.10.0
libtpu: 0.0.40
codegen_flags: <defaults>
</compile_context>

<pallas_src>
import functools

import jax
import jax.numpy as jnp
from jax.experimental import pallas as pl
from jax.experimental.pallas import tpu as pltpu

LANE = 128        # lane width (last dim granularity)
SUBLANE = 8       # f32 sublane granularity (second-to-last dim)
TILE_B_MAX = 256  # batch tile cap; sized for v7x's 64 MiB VMEM with headroom


def _round_up(n, m):
    return ((n + m - 1) // m) * m


def _embedding_mlp_kernel(x_ref, w1_ref, b1_ref, w2_ref, b2_ref,
                          w3_ref, b3_ref, out_ref):
    """Fused MLP: relu(relu(x@W1+b1)@W2+b2)@W3+b3, bf16 MXU / f32 accumulate."""
    x = x_ref[...]
    h1 = jnp.dot(x, w1_ref[...], preferred_element_type=jnp.float32)
    h1 = jnp.maximum(h1 + b1_ref[...].astype(jnp.float32), 0.0).astype(x.dtype)
    h2 = jnp.dot(h1, w2_ref[...], preferred_element_type=jnp.float32)
    h2 = jnp.maximum(h2 + b2_ref[...].astype(jnp.float32), 0.0).astype(x.dtype)
    out = jnp.dot(h2, w3_ref[...], preferred_element_type=jnp.float32)
    out_ref[...] = (out + b3_ref[...].astype(jnp.float32)).astype(out_ref.dtype)


def _embedding_padded(x_pad, params_pad):
    """x_pad: (B_pad, D_pad) bf16, B_pad multiple of SUBLANE (and of the batch
    tile).  Returns the padded (B_pad, E_pad) f32 embedding slab."""
    w1, b1, w2, b2, w3, b3 = params_pad
    b_pad, d_pad = x_pad.shape
    h_pad = w1.shape[1]
    e_pad = w3.shape[1]

    tile_b = min(b_pad, TILE_B_MAX)
    grid = (b_pad // tile_b,)

    flops = 2 * b_pad * (d_pad * h_pad + h_pad * h_pad + h_pad * e_pad)
    bytes_accessed = (
        x_pad.size * x_pad.dtype.itemsize
        + sum(p.size * p.dtype.itemsize for p in params_pad)
        + b_pad * e_pad * 4)

    x_spec = pl.BlockSpec((tile_b, d_pad), lambda i: (i, 0))
    # Weights/biases: full-array blocks with a constant index_map, so they are
    # DMA'd once and stay VMEM-resident across batch tiles.
    const_map = lambda i: (0, 0)
    param_specs = [pl.BlockSpec(p.shape, const_map) for p in params_pad]
    out_spec = pl.BlockSpec((tile_b, e_pad), lambda i: (i, 0))

    return pl.pallas_call(
        _embedding_mlp_kernel,
        out_shape=jax.ShapeDtypeStruct((b_pad, e_pad), jnp.float32),
        grid=grid,
        in_specs=[x_spec] + param_specs,
        out_specs=out_spec,
        compiler_params=pltpu.CompilerParams(
            dimension_semantics=("parallel",)),
        cost_estimate=pl.CostEstimate(
            flops=flops, transcendentals=0, bytes_accessed=bytes_accessed),
    )(x_pad, w1, b1, w2, b2, w3, b3)


def _pad_batch_rows(b_total):
    if b_total <= TILE_B_MAX:
        return _round_up(b_total, SUBLANE)
    return _round_up(b_total, TILE_B_MAX)


@functools.partial(jax.jit, static_argnames=("emb",))
def siamese_forward(x1, x2, params_pad, *, emb):
    """SiameseNet.forward: both branches fused into a single pallas_call."""
    b1 = x1.shape[0]
    b2 = x2.shape[0]
    d_pad = params_pad[0].shape[0]

    xf = jnp.concatenate(
        [x1.reshape(b1, -1), x2.reshape(b2, -1)], axis=0).astype(jnp.bfloat16)
    b_tot = b1 + b2
    b_pad = _pad_batch_rows(b_tot)
    xf = jnp.pad(xf, ((0, b_pad - b_tot), (0, d_pad - xf.shape[1])))

    out = _embedding_padded(xf, params_pad)       # (b_pad, e_pad) f32, lane-dense
    return out[:b1, :emb], out[b1:b_tot, :emb]


@functools.partial(jax.jit, static_argnames=("emb",))
def get_embedding(x, params_pad, *, emb):
    """SiameseNet.get_embedding(x)."""
    b = x.shape[0]
    d_pad = params_pad[0].shape[0]
    xf = x.reshape(b, -1).astype(jnp.bfloat16)
    b_pad = _pad_batch_rows(b)
    xf = jnp.pad(xf, ((0, b_pad - b), (0, d_pad - xf.shape[1])))
    return _embedding_padded(xf, params_pad)[:b, :emb]


def init_params(key, in_dim, hidden, emb):
    """Deterministic parameter init (uniform fan-in scaling, like nn.Linear)."""
    ks = jax.random.split(key, 6)

    def lin(kw, kb, d_in, d_out):
        bound = float(1.0 / (d_in ** 0.5))
        w = jax.random.uniform(kw, (d_in, d_out), jnp.float32, -bound, bound)
        b = jax.random.uniform(kb, (1, d_out), jnp.float32, -bound, bound)
        return w, b

    w1, b1 = lin(ks[0], ks[1], in_dim, hidden)
    w2, b2 = lin(ks[2], ks[3], hidden, hidden)
    w3, b3 = lin(ks[4], ks[5], hidden, emb)
    return (w1, b1, w2, b2, w3, b3)


def prepare_kernel_params(params, dtype=jnp.bfloat16):
    """Zero-pad feature dims to lane (128) granularity and cast to bf16.
    Zero padding is exact: padded hidden units are relu(0)=0 and padded output
    columns are 0, so the unpadded slice is bit-identical math."""
    w1, b1, w2, b2, w3, b3 = params
    d_in, hidden = w1.shape
    emb = w3.shape[1]
    d_pad = _round_up(d_in, LANE)
    h_pad = _round_up(hidden, LANE)
    e_pad = _round_up(emb, LANE)

    def pad2(a, rows, cols):
        return jnp.pad(a, ((0, rows - a.shape[0]), (0, cols - a.shape[1])))

    return (pad2(w1, d_pad, h_pad).astype(dtype),
            pad2(b1, 1, h_pad).astype(dtype),
            pad2(w2, h_pad, h_pad).astype(dtype),
            pad2(b2, 1, h_pad).astype(dtype),
            pad2(w3, h_pad, e_pad).astype(dtype),
            pad2(b3, 1, e_pad).astype(dtype))


def _reference(x_flat, params, dtype=jnp.bfloat16):
    """Plain-JAX reference of the same bf16-input / f32-accumulate MLP."""
    w1, b1, w2, b2, w3, b3 = params
    x = x_flat.astype(dtype)
    h = jnp.dot(x, w1.astype(dtype), preferred_element_type=jnp.float32)
    h = jnp.maximum(h + b1.astype(dtype).astype(jnp.float32), 0.0).astype(dtype)
    h = jnp.dot(h, w2.astype(dtype), preferred_element_type=jnp.float32)
    h = jnp.maximum(h + b2.astype(dtype).astype(jnp.float32), 0.0).astype(dtype)
    out = jnp.dot(h, w3.astype(dtype), preferred_element_type=jnp.float32)
    return out + b3.astype(dtype).astype(jnp.float32)


if __name__ == "__main__":
    # Small shapes consistent with an image Siamese setup: NCHW = (2, 4, 16, 16).
    B, C, H, W = 2, 4, 16, 16
    HIDDEN, EMB = 32, 2
    D = C * H * W

    key = jax.random.PRNGKey(0)
    k_x1, k_x2, k_p = jax.random.split(key, 3)
    x1 = jax.random.normal(k_x1, (B, C, H, W), jnp.float32)
    x2 = jax.random.normal(k_x2, (B, C, H, W), jnp.float32)

    params = init_params(k_p, D, HIDDEN, EMB)
    kernel_params = prepare_kernel_params(params)

    out1, out2 = siamese_forward(x1, x2, kernel_params, emb=EMB)
    out1 = jax.block_until_ready(out1)
    out2 = jax.block_until_ready(out2)

    # Sanity check against a plain-JAX reference with the same bf16 numerics.
    ref1 = _reference(x1.reshape(B, -1), params)
    ref2 = _reference(x2.reshape(B, -1), params)
    assert out1.shape == (B, EMB) and out2.shape == (B, EMB)
    assert jnp.allclose(out1, ref1, atol=1e-2, rtol=1e-2)
    assert jnp.allclose(out2, ref2, atol=1e-2, rtol=1e-2)

    # get_embedding path (same shared kernel / weights).
    emb1 = jax.block_until_ready(get_embedding(x1, kernel_params, emb=EMB))
    assert jnp.allclose(emb1, out1, atol=1e-6, rtol=1e-6)

    print("KERNEL_OK")
</pallas_src>

<mosaic_0001>
module attributes {stable_mosaic.version = 11 : i64} {
  func.func @_embedding_mlp_kernel(%arg0: i32, %arg1: memref<8x1024xbf16, #tpu.memory_space<vmem>>, %arg2: memref<1024x128xbf16, #tpu.memory_space<vmem>>, %arg3: memref<1x128xbf16, #tpu.memory_space<vmem>>, %arg4: memref<128x128xbf16, #tpu.memory_space<vmem>>, %arg5: memref<1x128xbf16, #tpu.memory_space<vmem>>, %arg6: memref<128x128xbf16, #tpu.memory_space<vmem>>, %arg7: memref<1x128xbf16, #tpu.memory_space<vmem>>, %arg8: memref<8x128xf32, #tpu.memory_space<vmem>>) attributes {dimension_semantics = [#tpu.dimension_semantics<parallel>], iteration_bounds = array<i64: 1>, scalar_prefetch = 0 : i64, scratch_operands = 0 : i64, tpu.core_type = #tpu.core_type<tc>, window_params = [{transform_indices = @transform_0, window_bounds = array<i64: 8, 1024>}, {pipeline_mode = #tpu.pipeline_mode<synchronous>, transform_indices = @transform_1, window_bounds = array<i64: 1024, 128>}, {pipeline_mode = #tpu.pipeline_mode<synchronous>, transform_indices = @transform_2, window_bounds = array<i64: 1, 128>}, {pipeline_mode = #tpu.pipeline_mode<synchronous>, transform_indices = @transform_3, window_bounds = array<i64: 128, 128>}, {pipeline_mode = #tpu.pipeline_mode<synchronous>, transform_indices = @transform_4, window_bounds = array<i64: 1, 128>}, {pipeline_mode = #tpu.pipeline_mode<synchronous>, transform_indices = @transform_5, window_bounds = array<i64: 128, 128>}, {pipeline_mode = #tpu.pipeline_mode<synchronous>, transform_indices = @transform_6, window_bounds = array<i64: 1, 128>}, {transform_indices = @transform_7, window_bounds = array<i64: 8, 128>}]} {
    %c0 = arith.constant 0 : index
    %c0_0 = arith.constant 0 : index
    %0 = vector.load %arg1[%c0, %c0_0] : memref<8x1024xbf16, #tpu.memory_space<vmem>>, vector<8x1024xbf16>
    %c0_1 = arith.constant 0 : index
    %c0_2 = arith.constant 0 : index
    %1 = vector.load %arg2[%c0_1, %c0_2] : memref<1024x128xbf16, #tpu.memory_space<vmem>>, vector<1024x128xbf16>
    %cst = arith.constant dense<0.000000e+00> : vector<8x128xf32>
    %2 = tpu.matmul %0, %1, %cst {dimension_numbers = #tpu.dot_dimension_numbers<[1], [0], [0], [1], [0, 0, 1, 1], [], []>} : vector<8x1024xbf16>, vector<1024x128xbf16>, vector<8x128xf32> -> vector<8x128xf32>
    %c0_3 = arith.constant 0 : index
    %c0_4 = arith.constant 0 : index
    %3 = vector.load %arg3[%c0_3, %c0_4] : memref<1x128xbf16, #tpu.memory_space<vmem>>, vector<1x128xbf16>
    %4 = arith.extf %3 : vector<1x128xbf16> to vector<1x128xf32>
    %5 = vector.broadcast %4 : vector<1x128xf32> to vector<8x128xf32>
    %6 = arith.addf %2, %5 : vector<8x128xf32>
    %cst_5 = arith.constant 0.000000e+00 : f32
    %7 = vector.broadcast %cst_5 : f32 to vector<8x128xf32>
    %8 = arith.maximumf %6, %7 : vector<8x128xf32>
    %9 = arith.truncf %8 : vector<8x128xf32> to vector<8x128xbf16>
    %c0_6 = arith.constant 0 : index
    %c0_7 = arith.constant 0 : index
    %10 = vector.load %arg4[%c0_6, %c0_7] : memref<128x128xbf16, #tpu.memory_space<vmem>>, vector<128x128xbf16>
    %cst_8 = arith.constant dense<0.000000e+00> : vector<8x128xf32>
    %11 = tpu.matmul %9, %10, %cst_8 {dimension_numbers = #tpu.dot_dimension_numbers<[1], [0], [0], [1], [0, 0, 1, 1], [], []>} : vector<8x128xbf16>, vector<128x128xbf16>, vector<8x128xf32> -> vector<8x128xf32>
    %c0_9 = arith.constant 0 : index
    %c0_10 = arith.constant 0 : index
    %12 = vector.load %arg5[%c0_9, %c0_10] : memref<1x128xbf16, #tpu.memory_space<vmem>>, vector<1x128xbf16>
    %13 = arith.extf %12 : vector<1x128xbf16> to vector<1x128xf32>
    %14 = vector.broadcast %13 : vector<1x128xf32> to vector<8x128xf32>
    %15 = arith.addf %11, %14 : vector<8x128xf32>
    %cst_11 = arith.constant 0.000000e+00 : f32
    %16 = vector.broadcast %cst_11 : f32 to vector<8x128xf32>
    %17 = arith.maximumf %15, %16 : vector<8x128xf32>
    %18 = arith.truncf %17 : vector<8x128xf32> to vector<8x128xbf16>
    %c0_12 = arith.constant 0 : index
    %c0_13 = arith.constant 0 : index
    %19 = vector.load %arg6[%c0_12, %c0_13] : memref<128x128xbf16, #tpu.memory_space<vmem>>, vector<128x128xbf16>
    %cst_14 = arith.constant dense<0.000000e+00> : vector<8x128xf32>
    %20 = tpu.matmul %18, %19, %cst_14 {dimension_numbers = #tpu.dot_dimension_numbers<[1], [0], [0], [1], [0, 0, 1, 1], [], []>} : vector<8x128xbf16>, vector<128x128xbf16>, vector<8x128xf32> -> vector<8x128xf32>
    %c0_15 = arith.constant 0 : index
    %c0_16 = arith.constant 0 : index
    %21 = vector.load %arg7[%c0_15, %c0_16] : memref<1x128xbf16, #tpu.memory_space<vmem>>, vector<1x128xbf16>
    %22 = arith.extf %21 : vector<1x128xbf16> to vector<1x128xf32>
    %23 = vector.broadcast %22 : vector<1x128xf32> to vector<8x128xf32>
    %24 = arith.addf %20, %23 : vector<8x128xf32>
    %c0_17 = arith.constant 0 : index
    %c0_18 = arith.constant 0 : index
    %25 = vector.load %arg8[%c0_17, %c0_18] : memref<8x128xf32, #tpu.memory_space<vmem>>, vector<8x128xf32>
    tpu.vector_store %arg8[%c0_17, %c0_18], %24 {strides = array<i32>} : memref<8x128xf32, #tpu.memory_space<vmem>>, vector<8x128xf32>,
    return
  }
  func.func @transform_0(%arg0: i32) -> (i32, i32) {
    %c0_i32 = arith.constant 0 : i32
    %c0_i32_0 = arith.constant 0 : i32
    return %arg0, %c0_i32 : i32, i32
  }
  func.func @transform_1(%arg0: i32) -> (i32, i32) {
    %c0_i32 = arith.constant 0 : i32
    %c0_i32_0 = arith.constant 0 : i32
    %c0_i32_1 = arith.constant 0 : i32
    return %c0_i32, %c0_i32_0 : i32, i32
  }
  func.func @transform_2(%arg0: i32) -> (i32, i32) {
    %c0_i32 = arith.constant 0 : i32
    %c0_i32_0 = arith.constant 0 : i32
    %c0_i32_1 = arith.constant 0 : i32
    return %c0_i32, %c0_i32_0 : i32, i32
  }
  func.func @transform_3(%arg0: i32) -> (i32, i32) {
    %c0_i32 = arith.constant 0 : i32
    %c0_i32_0 = arith.constant 0 : i32
    %c0_i32_1 = arith.constant 0 : i32
    return %c0_i32, %c0_i32_0 : i32, i32
  }
  func.func @transform_4(%arg0: i32) -> (i32, i32) {
    %c0_i32 = arith.constant 0 : i32
    %c0_i32_0 = arith.constant 0 : i32
    %c0_i32_1 = arith.constant 0 : i32
    return %c0_i32, %c0_i32_0 : i32, i32
  }
  func.func @transform_5(%arg0: i32) -> (i32, i32) {
    %c0_i32 = arith.constant 0 : i32
    %c0_i32_0 = arith.constant 0 : i32
    %c0_i32_1 = arith.constant 0 : i32
    return %c0_i32, %c0_i32_0 : i32, i32
  }
  func.func @transform_6(%arg0: i32) -> (i32, i32) {
    %c0_i32 = arith.constant 0 : i32
    %c0_i32_0 = arith.constant 0 : i32
    %c0_i32_1 = arith.constant 0 : i32
    return %c0_i32, %c0_i32_0 : i32, i32
  }
  func.func @transform_7(%arg0: i32) -> (i32, i32) {
    %c0_i32 = arith.constant 0 : i32
    %c0_i32_0 = arith.constant 0 : i32
    return %arg0, %c0_i32 : i32, i32
  }
}

</mosaic_0001>

<bundles_post_ra>
// kernel: siamese_forward.1
= control target key start
LH: loop header
LB: loop body
LE: loop exit
PB: predicated region body
PF: predicated region fallthrough
CT: control target
= control target key end

     0   :  { %12 = vsyncpa [#allocation3], 0  ;;  %s1621_s0 = inlined_call_operand.vmem [shape: bf16[8,1024], index: 0, kind: input, shape index: {}]   ;;  %s1622_s1 = inlined_call_operand.vmem [shape: bf16[1024,128], index: 1, kind: input, shape index: {}]   ;;  %s1623_s2 = inlined_call_operand.vmem [shape: bf16[1,128], index: 2, kind: input, shape index: {}]   ;;  %s1624_s3 = inlined_call_operand.vmem [shape: bf16[128,128], index: 3, kind: input, shape index: {}]   ;;  %s1625_s4 = inlined_call_operand.hbm [shape: bf16[1,128], index: 4, kind: input, shape index: {}]   ;;  %s1626_s5 = inlined_call_operand.hbm [shape: bf16[128,128], index: 5, kind: input, shape index: {}]   ;;  %s1627_s6 = inlined_call_operand.vmem [shape: bf16[1,128], index: 6, kind: input, shape index: {}]   ;;  %s1628_s7 = inlined_call_operand.vmem [shape: f32[8,128], index: 7, kind: output, shape index: {}]  }
   0x1   :  { %s27_s26 = sshll.u32 %s1625_s4, 4  ;;  %s28_s26 = int_to_ptr.hbm [resolvable:$true] %s27_s26 }
   0x2   :  { %13 = vsyncpa [#allocation5], 0  ;;  %s1334_s27 = smov [#allocation2]   ;;  %s37_s8 = sshll.u32 %s1626_s5, 4  ;;  %s38_s8 = int_to_ptr.hbm [resolvable:$true] %s37_s8 }
   0x3   :  { %s29_s28 = sshll.u32 %s1334_s27, 4  ;;  %s1335_s9 = smov [#allocation4]   ;;  %s30_s28 = int_to_ptr.vmem [resolvable:$true] %s29_s28 }
   0x4   :  { %32 = dma.hbm_to_vmem [thread:$0]  %s28_s26, 16, %s30_s28, [#allocation3]  }
   0x5   :  { %s39_s10 = sshll.u32 %s1335_s9, 4  ;;  %s1336_s11 = smov 64   ;;  %s40_s10 = int_to_ptr.vmem [resolvable:$true] %s39_s10 }
   0x6   :  { %s1337_s12 = smov 4  }
   0x7   :  { %45 = dma.hbm_to_vmem [thread:$0]  %s38_s8, 1024, %s40_s10, [#allocation5], %s1336_s11, %s1336_s11, %s1337_s12  }
   0x8   :  { %1330 = dma.done.wait [#allocation3], 16  }
   0x9   :  { %1331 = vsyncadd [#allocation3], 4294967280 }
   0xa   :  { %1332 = dma.done.wait [#allocation5], 1024  }
   0xb   :  { %1333 = vsyncadd [#allocation5], 4294966272  ;;  %v1205_v0 = vld [vmem:[%s1622_s1 + $0x38] sm:$0xff]  ;;  %v1204_v4 = vld [vmem:[%s1622_s1 + $0x30] sm:$0xff] }
   0xc   :  { %v1213_v1 = vld [vmem:[%s1622_s1 + $0x78] sm:$0xff]  ;;  %603 = vmatpush.bf16.msra.mxu0 %v1205_v0  ;;  %v1212_v5 = vld [vmem:[%s1622_s1 + $0x70] sm:$0xff]  ;;  %v1203_v8 = vld [vmem:[%s1622_s1 + $0x28] sm:$0xff] }
   0xd   :  { %v1221_v2 = vld [vmem:[%s1622_s1 + $0xb8] sm:$0xff]  ;;  %616 = vmatpush.bf16.msra.mxu1 %v1213_v1  ;;  %v1220_v6 = vld [vmem:[%s1622_s1 + $0xb0] sm:$0xff]  ;;  %v1211_v9 = vld [vmem:[%s1622_s1 + $0x68] sm:$0xff] }
   0xe   :  { %v1229_v3 = vld [vmem:[%s1622_s1 + $0xf8] sm:$0xff]  ;;  %629 = vmatpush.bf16.msra.mxu2 %v1221_v2  ;;  %v1228_v7 = vld [vmem:[%s1622_s1 + $0xf0] sm:$0xff]  ;;  %v1219_v10 = vld [vmem:[%s1622_s1 + $0xa8] sm:$0xff] }
   0xf   :  { %642 = vmatpush.bf16.msra.mxu3 %v1229_v3  ;;  %v1227_v11 = vld [vmem:[%s1622_s1 + $0xe8] sm:$0xff]  ;;  %v1202_v12 = vld [vmem:[%s1622_s1 + $0x20] sm:$0xff]  ;;  %v1201_v16 = vld [vmem:[%s1622_s1 + $0x18] sm:$0xff] }
  0x10   :  { %604 = vmatpush.bf16.msra.mxu0 %v1204_v4  ;;  %v1210_v13 = vld [vmem:[%s1622_s1 + $0x60] sm:$0xff]  ;;  %v1209_v17 = vld [vmem:[%s1622_s1 + $0x58] sm:$0xff]  ;;  %v1200_v20 = vld [vmem:[%s1622_s1 + $0x10] sm:$0xff] }
  0x11   :  { %617 = vmatpush.bf16.msra.mxu1 %v1212_v5  ;;  %v1218_v14 = vld [vmem:[%s1622_s1 + $0xa0] sm:$0xff]  ;;  %v1217_v18 = vld [vmem:[%s1622_s1 + $0x98] sm:$0xff]  ;;  %v1208_v21 = vld [vmem:[%s1622_s1 + $0x50] sm:$0xff] }
  0x12   :  { %630 = vmatpush.bf16.msra.mxu2 %v1220_v6  ;;  %v1226_v15 = vld [vmem:[%s1622_s1 + $0xe0] sm:$0xff]  ;;  %v1225_v19 = vld [vmem:[%s1622_s1 + $0xd8] sm:$0xff]  ;;  %v1216_v22 = vld [vmem:[%s1622_s1 + $0x90] sm:$0xff] }
  0x13   :  { %643 = vmatpush.bf16.msra.mxu3 %v1228_v7  ;;  %v1224_v23 = vld [vmem:[%s1622_s1 + $0xd0] sm:$0xff]  ;;  %v1199_v24 = vld [vmem:[%s1622_s1 + $0x8] sm:$0xff]  ;;  %v56_v29 = vld [vmem:[%s1621_s0] sm:$0xff] }
  0x14   :  { %605 = vmatpush.bf16.msra.mxu0 %v1203_v8  ;;  %v1207_v25 = vld [vmem:[%s1622_s1 + $0x48] sm:$0xff]  ;;  %v1198_v30 = vld [vmem:[%s1622_s1] sm:$0xff]  ;;  %v195_v33 = vunpack.c.l.b16 %v56_v29  ;;  %v196_v37 = vunpack.c.h.b16 %v56_v29  ;;  %v1237_v38 = vld [vmem:[%s1622_s1 + $0x138] sm:$0xff] }
  0x15   :  { %618 = vmatpush.bf16.msra.mxu1 %v1211_v9  ;;  %v1215_v26 = vld [vmem:[%s1622_s1 + $0x88] sm:$0xff]  ;;  %v1206_v31 = vld [vmem:[%s1622_s1 + $0x40] sm:$0xff]  ;;  %v1245_v39 = vld [vmem:[%s1622_s1 + $0x178] sm:$0xff] }
  0x16   :  { %631 = vmatpush.bf16.msra.mxu2 %v1219_v10  ;;  %v1223_v27 = vld [vmem:[%s1622_s1 + $0xc8] sm:$0xff]  ;;  %v1214_v34 = vld [vmem:[%s1622_s1 + $0x80] sm:$0xff]  ;;  %v1253_v40 = vld [vmem:[%s1622_s1 + $0x1b8] sm:$0xff]  ;;  %v203_v43 = vpack.c.b16 %v195_v33, %v195_v33  ;;  %v204_v45 = vpack.c.b16 %v196_v37, %v196_v37 }
  0x17   :  { %644 = vmatpush.bf16.msra.mxu3 %v1227_v11  ;;  %v57_v28 = vld [vmem:[%s1621_s0 + $0x8] sm:$0xff]  ;;  %v1222_v35 = vld [vmem:[%s1622_s1 + $0xc0] sm:$0xff]  ;;  %v1261_v41 = vld [vmem:[%s1622_s1 + $0x1f8] sm:$0xff] }
  0x18   :  { %606 = vmatpush.bf16.msra.mxu0 %v1202_v12  ;;  %v197_v32 = vunpack.c.l.b16 %v57_v28  ;;  %v198_v36 = vunpack.c.h.b16 %v57_v28  ;;  %v1236_v46 = vld [vmem:[%s1622_s1 + $0x130] sm:$0xff]  ;;  %v1235_v50 = vld [vmem:[%s1622_s1 + $0x128] sm:$0xff]  ;;  %v1234_v54 = vld [vmem:[%s1622_s1 + $0x120] sm:$0xff] }
  0x19   :  { %619 = vmatpush.bf16.msra.mxu1 %v1210_v13  ;;  %v1244_v47 = vld [vmem:[%s1622_s1 + $0x170] sm:$0xff]  ;;  %v1243_v51 = vld [vmem:[%s1622_s1 + $0x168] sm:$0xff]  ;;  %v1242_v55 = vld [vmem:[%s1622_s1 + $0x160] sm:$0xff] }
  0x1a   :  { %632 = vmatpush.bf16.msra.mxu2 %v1218_v14  ;;  %v205_v42 = vpack.c.b16 %v197_v32, %v197_v32  ;;  %v206_v44 = vpack.c.b16 %v198_v36, %v198_v36  ;;  %v1252_v48 = vld [vmem:[%s1622_s1 + $0x1b0] sm:$0xff]  ;;  %v1251_v52 = vld [vmem:[%s1622_s1 + $0x1a8] sm:$0xff]  ;;  %v1250_v56 = vld [vmem:[%s1622_s1 + $0x1a0] sm:$0xff] }
  0x1b   :  { %645 = vmatpush.bf16.msra.mxu3 %v1226_v15  ;;  %v1260_v49 = vld [vmem:[%s1622_s1 + $0x1f0] sm:$0xff]  ;;  %v1259_v53 = vld [vmem:[%s1622_s1 + $0x1e8] sm:$0xff]  ;;  %v1258_v57 = vld [vmem:[%s1622_s1 + $0x1e0] sm:$0xff] }
  0x1c   :  { %607 = vmatpush.bf16.msra.mxu0 %v1201_v16  ;;  %v1233_v58 = vld [vmem:[%s1622_s1 + $0x118] sm:$0xff]  ;;  %v1232_v62 = vld [vmem:[%s1622_s1 + $0x110] sm:$0xff]  ;;  %v1231_v2 = vld [vmem:[%s1622_s1 + $0x108] sm:$0xff] }
  0x1d   :  { %620 = vmatpush.bf16.msra.mxu1 %v1209_v17  ;;  %v1241_v59 = vld [vmem:[%s1622_s1 + $0x158] sm:$0xff]  ;;  %v1240_v63 = vld [vmem:[%s1622_s1 + $0x150] sm:$0xff]  ;;  %v1239_v3 = vld [vmem:[%s1622_s1 + $0x148] sm:$0xff] }
  0x1e   :  { %633 = vmatpush.bf16.msra.mxu2 %v1217_v18  ;;  %v1249_v60 = vld [vmem:[%s1622_s1 + $0x198] sm:$0xff]  ;;  %v1248_v0 = vld [vmem:[%s1622_s1 + $0x190] sm:$0xff]  ;;  %v1247_v5 = vld [vmem:[%s1622_s1 + $0x188] sm:$0xff] }
  0x1f   :  { %646 = vmatpush.bf16.msra.mxu3 %v1225_v19  ;;  %v1257_v61 = vld [vmem:[%s1622_s1 + $0x1d8] sm:$0xff]  ;;  %v1256_v1 = vld [vmem:[%s1622_s1 + $0x1d0] sm:$0xff]  ;;  %v1255_v6 = vld [vmem:[%s1622_s1 + $0x1c8] sm:$0xff] }
  0x20   :  { %608 = vmatpush.bf16.msra.mxu0 %v1200_v20  ;;  %v58_v4 = vld [vmem:[%s1621_s0 + $0x10] sm:$0xff]  ;;  %v59_v7 = vld [vmem:[%s1621_s0 + $0x18] sm:$0xff]  ;;  %v1230_v10 = vld [vmem:[%s1622_s1 + $0x100] sm:$0xff] }
  0x21   :  { %621 = vmatpush.bf16.msra.mxu1 %v1208_v21  ;;  %v199_v8 = vunpack.c.l.b16 %v58_v4  ;;  %v200_v9 = vunpack.c.h.b16 %v58_v4  ;;  %v1238_v11 = vld [vmem:[%s1622_s1 + $0x140] sm:$0xff]  ;;  %v201_v12 = vunpack.c.l.b16 %v59_v7  ;;  %v202_v13 = vunpack.c.h.b16 %v59_v7  ;;  %v1269_v20 = vld [vmem:[%s1624_s3 + $0x38] sm:$0xff]  ;;  %v1268_v21 = vld [vmem:[%s1624_s3 + $0x30] sm:$0xff] }
  0x22   :  { %634 = vmatpush.bf16.msra.mxu2 %v1216_v22  ;;  %v1246_v14 = vld [vmem:[%s1622_s1 + $0x180] sm:$0xff]  ;;  %v1267_v22 = vld [vmem:[%s1624_s3 + $0x28] sm:$0xff] }
  0x23   :  { %647 = vmatpush.bf16.msra.mxu3 %v1224_v23  ;;  %v1254_v15 = vld [vmem:[%s1622_s1 + $0x1c0] sm:$0xff]  ;;  %v207_v16 = vpack.c.b16 %v199_v8, %v199_v8  ;;  %v208_v17 = vpack.c.b16 %v200_v9, %v200_v9  ;;  %v209_v18 = vpack.c.b16 %v201_v12, %v201_v12  ;;  %v210_v19 = vpack.c.b16 %v202_v13, %v202_v13  ;;  %v1263_v28 = vld [vmem:[%s1624_s3 + $0x8] sm:$0xff] }
  0x24   :  { %609 = vmatpush.bf16.msra.mxu0 %v1199_v24  ;;  %v1266_v23 = vld [vmem:[%s1624_s3 + $0x20] sm:$0xff]  ;;  %v1265_v24 = vld [vmem:[%s1624_s3 + $0x18] sm:$0xff] }
  0x25   :  { %622 = vmatpush.bf16.msra.mxu1 %v1207_v25  ;;  %v188_v29 = vld [vmem:[%s1623_s2] sm:$0x1] }
  0x26   :  { %635 = vmatpush.bf16.msra.mxu2 %v1215_v26  ;;  %v1264_v26 = vld [vmem:[%s1624_s3 + $0x10] sm:$0xff]  ;;  %v1262_v33 = vld [vmem:[%s1624_s3] sm:$0xff] }
  0x27   :  { %648 = vmatpush.bf16.msra.mxu3 %v1223_v27  ;;  %v1277_v37 = vld [vmem:[#allocation4 + $0x38] sm:$0xff] }
  0x28   :  { %610 = vmatpush.bf16.msra.mxu0 %v1198_v30  ;;  %v807_v9 = vld [vmem:[%s1627_s6] sm:$0x1] }
  0x29   :  { %623 = vmatpush.bf16.msra.mxu1 %v1206_v31 }
  0x2a   :  { %636 = vmatpush.bf16.msra.mxu2 %v1214_v34  ;;  %v189_v34 = vunpack.c.l.bf16 %v188_v29 }
  0x2b   :  { %649 = vmatpush.bf16.msra.mxu3 %v1222_v35  ;;  %611 = vmatmul.bf16.vlgmr.msra.gmra.mxu0 %v203_v43 }
  0x2c   :  { %655 = vmatpush.bf16.msrb.mxu0 %v1237_v38  ;;  %624 = vmatmul.bf16.vlgmr.msra.gmra.mxu1 %v204_v45  ;;  %v190_v36 = vperm.slane %v189_v34, 0 }
  0x2d   :  { %668 = vmatpush.bf16.msrb.mxu1 %v1245_v39  ;;  %637 = vmatmul.bf16.vlgmr.msra.gmra.mxu2 %v205_v42  ;;  %v1275_v42 = vld [vmem:[#allocation4 + $0x28] sm:$0xff] }
  0x2e   :  { %681 = vmatpush.bf16.msrb.mxu2 %v1253_v40  ;;  %650 = vmatmul.bf16.vlgmr.msra.gmra.mxu3 %v206_v44  ;;  %v1276_v40 = vld [vmem:[#allocation4 + $0x30] sm:$0xff]  ;;  %v1274_v44 = vld [vmem:[#allocation4 + $0x20] sm:$0xff] }
  0x2f   :  { %694 = vmatpush.bf16.msrb.mxu3 %v1261_v41 }
  0x30   :  { %656 = vmatpush.bf16.msrb.mxu0 %v1236_v46  ;;  %v1273_v46 = vld [vmem:[#allocation4 + $0x18] sm:$0xff] }
  0x31   :  { %669 = vmatpush.bf16.msrb.mxu1 %v1244_v47 }
  0x32   :  { %682 = vmatpush.bf16.msrb.mxu2 %v1252_v48 }
  0x33   :  { %695 = vmatpush.bf16.msrb.mxu3 %v1260_v49 }
  0x34   :  { %657 = vmatpush.bf16.msrb.mxu0 %v1235_v50 }
  0x35   :  { %670 = vmatpush.bf16.msrb.mxu1 %v1243_v51  ;;  %v1272_v51 = vld [vmem:[#allocation4 + $0x10] sm:$0xff] }
  0x36   :  { %683 = vmatpush.bf16.msrb.mxu2 %v1251_v52 }
  0x37   :  { %696 = vmatpush.bf16.msrb.mxu3 %v1259_v53 }
  0x38   :  { %658 = vmatpush.bf16.msrb.mxu0 %v1234_v54 }
  0x39   :  { %671 = vmatpush.bf16.msrb.mxu1 %v1242_v55 }
  0x3a   :  { %684 = vmatpush.bf16.msrb.mxu2 %v1250_v56 }
  0x3b   :  { %697 = vmatpush.bf16.msrb.mxu3 %v1258_v57 }
  0x3c   :  { %659 = vmatpush.bf16.msrb.mxu0 %v1233_v58 }
  0x3d   :  { %672 = vmatpush.bf16.msrb.mxu1 %v1241_v59 }
  0x3e   :  { %685 = vmatpush.bf16.msrb.mxu2 %v1249_v60 }
  0x3f   :  { %698 = vmatpush.bf16.msrb.mxu3 %v1257_v61 }
  0x40   :  { %660 = vmatpush.bf16.msrb.mxu0 %v1232_v62 }
  0x41   :  { %673 = vmatpush.bf16.msrb.mxu1 %v1240_v63  ;;  %v1271_v63 = vld [vmem:[#allocation4 + $0x8] sm:$0xff] }
  0x42   :  { %686 = vmatpush.bf16.msrb.mxu2 %v1248_v0  ;;  %v1270_v0 = vld [vmem:[#allocation4] sm:$0xff] }
  0x43   :  { %699 = vmatpush.bf16.msrb.mxu3 %v1256_v1  ;;  %v725_v1 = vld [vmem:[#allocation2] sm:$0x1] }
  0x44   :  { %661 = vmatpush.bf16.msrb.mxu0 %v1231_v2  ;;  %v726_v2 = vunpack.c.l.bf16 %v725_v1 }
  0x45   :  { %674 = vmatpush.bf16.msrb.mxu1 %v1239_v3 }
  0x46   :  { %687 = vmatpush.bf16.msrb.mxu2 %v1247_v5  ;;  %v727_v3 = vperm.slane %v726_v2, 0 }
  0x47   :  { %700 = vmatpush.bf16.msrb.mxu3 %v1255_v6 }
  0x48   :  { %662 = vmatpush.bf16.msrb.mxu0 %v1230_v10  ;;  %v808_v10 = vunpack.c.l.bf16 %v807_v9 }
  0x49   :  { %675 = vmatpush.bf16.msrb.mxu1 %v1238_v11 }
  0x4a   :  { %688 = vmatpush.bf16.msrb.mxu2 %v1246_v14  ;;  %v809_v11 = vperm.slane %v808_v10, 0 }
  0x4b   :  { %701 = vmatpush.bf16.msrb.mxu3 %v1254_v15  ;;  %663 = vmatmul.bf16.vlgmr.msrb.gmra.mxu0 %v207_v16 }
  0x4c   :  { %676 = vmatmul.bf16.vlgmr.msrb.gmra.mxu1 %v208_v17  ;;  %776 = vmatpush.bf16.msra.mxu0 %v1269_v20 }
  0x4d   :  { %689 = vmatmul.bf16.vlgmr.msrb.gmra.mxu2 %v209_v18  ;;  %858 = vmatpush.bf16.msra.mxu1 %v1277_v37 }
  0x4e   :  { %702 = vmatmul.bf16.vlgmr.msrb.gmra.mxu3 %v210_v19 }
  0x50   :  { %777 = vmatpush.bf16.msra.mxu0 %v1268_v21 }
  0x51   :  { %859 = vmatpush.bf16.msra.mxu1 %v1276_v40 }
  0x54   :  { %778 = vmatpush.bf16.msra.mxu0 %v1267_v22 }
  0x55   :  { %860 = vmatpush.bf16.msra.mxu1 %v1275_v42 }
  0x58   :  { %779 = vmatpush.bf16.msra.mxu0 %v1266_v23 }
  0x59   :  { %861 = vmatpush.bf16.msra.mxu1 %v1274_v44 }
  0x5c   :  { %780 = vmatpush.bf16.msra.mxu0 %v1265_v24 }
  0x5d   :  { %862 = vmatpush.bf16.msra.mxu1 %v1273_v46 }
  0x60   :  { %781 = vmatpush.bf16.msra.mxu0 %v1264_v26 }
  0x61   :  { %863 = vmatpush.bf16.msra.mxu1 %v1272_v51 }
  0x64   :  { %782 = vmatpush.bf16.msra.mxu0 %v1263_v28 }
  0x65   :  { %864 = vmatpush.bf16.msra.mxu1 %v1271_v63 }
  0x68   :  { %783 = vmatpush.bf16.msra.mxu0 %v1262_v33 }
  0x69   :  { %865 = vmatpush.bf16.msra.mxu1 %v1270_v0 }
  0xa8   :  { %v612_v25 = vpop.f32.mrf.mxu0 }
  0xa9   :  { %v625_v27 = vpop.f32.mrf.mxu1  ;;  %v613_v41 = vadd.f32 %v612_v25, %v190_v36 }
  0xab   :  { %v626_v43 = vadd.f32 %v625_v27, %v613_v41 }
  0xb0   :  { %v638_v30 = vpop.f32.mrf.mxu2  ;;  %v614_v32 = vpop.f32.mrf.mxu0 }
  0xb1   :  { %v651_v31 = vpop.f32.mrf.mxu3  ;;  %v627_v35 = vpop.f32.mrf.mxu1  ;;  %v639_v45 = vadd.f32 %v638_v30, %v626_v43 }
  0xb3   :  { %v652_v47 = vadd.f32 %v651_v31, %v639_v45 }
  0xb8   :  { %v640_v38 = vpop.f32.mrf.mxu2 }
  0xb9   :  { %v653_v39 = vpop.f32.mrf.mxu3 }
  0xc8   :  { %v664_v48 = vpop.f32.mrf.mxu0 }
  0xc9   :  { %v677_v49 = vpop.f32.mrf.mxu1  ;;  %v665_v50 = vadd.f32 %v664_v48, %v652_v47 }
  0xcb   :  { %v678_v52 = vadd.f32 %v677_v49, %v665_v50 }
  0xd0   :  { %v690_v53 = vpop.f32.mrf.mxu2  ;;  %v666_v56 = vpop.f32.mrf.mxu0 }
  0xd1   :  { %v703_v54 = vpop.f32.mrf.mxu3  ;;  %v691_v55 = vadd.f32 %v690_v53, %v678_v52  ;;  %v679_v57 = vpop.f32.mrf.mxu1 }
  0xd3   :  { %v704_v58 = vadd.f32 %v703_v54, %v691_v55 }
  0xd5   :  { %v707_v59 = vmax.f32 %v704_v58, 0.0 }
  0xd7   :  { %v708_v60 = vpack.c.bf16 %v707_v59, %v707_v59 }
  0xd8   :  { %v692_v61 = vpop.f32.mrf.mxu2 }
  0xd9   :  { %v705_v62 = vpop.f32.mrf.mxu3  ;;  %784 = vmatmul.bf16.vlgmr.msra.gmra.mxu0 %v708_v60 }
 0x156   :  { %v785_v4 = vpop.f32.mrf.mxu0 }
 0x157   :  { %v786_v5 = vadd.f32 %v785_v4, %v727_v3 }
 0x159   :  { %v789_v6 = vmax.f32 %v786_v5, 0.0 }
 0x15b   :  { %v790_v7 = vpack.c.bf16 %v789_v6, %v789_v6 }
 0x15d   :  { %866 = vmatmul.bf16.vlgmr.msra.gmra.mxu1 %v790_v7 }
 0x15e   :  { %v787_v8 = vpop.f32.mrf.mxu0 }
 0x1da   :  { %v867_v12 = vpop.f32.mrf.mxu1 }
 0x1db   :  { %v868_v13 = vadd.f32 %v867_v12, %v809_v11 }
 0x1dd   :  { %871 = vst [vmem:[%s1628_s7] sm:$0xff] %v868_v13 }
 0x1e2   :  { %v869_v14 = vpop.f32.mrf.mxu1 }
 0x1e3   :  { %876 = vsyncpa [#allocation3], 1 }
 0x1e4   :  { %877 = vsyncpa [#allocation5], 1 }

</bundles_post_ra>
